<compile_context>
chip_gen: v6e
topology: v6e:2x2x1
jax: 0.10.0
libtpu: 0.0.40
codegen_flags: <defaults>
</compile_context>

<pallas_src>
import math
from functools import partial

import jax
import jax.numpy as jnp
from jax.experimental import pallas as pl
from jax.experimental.pallas import tpu as pltpu


def _round_up(x, m):
    return (x + m - 1) // m * m


# ------------------------------ Pallas kernel -------------------------------

def _arc_margin_kernel(x_ref, xagg_ref, wself_ref, wneigh_ref, bias_ref,
                       warc_t_ref, label_ref, feat_ref, out_ref, hn_ref,
                       *, s, cos_m, sin_m, th, mm, easy_margin):
    j = pl.program_id(1)  # class-tile index

    # ---- SAGEConv linear part + ReLU + row L2-normalize: once per row tile --
    @pl.when(j == 0)
    def _():
        # MXU matmuls: bf16 operands, f32 accumulation.
        feat = jnp.dot(x_ref[...], wself_ref[...],
                       preferred_element_type=jnp.float32)
        feat = feat + jnp.dot(xagg_ref[...], wneigh_ref[...],
                              preferred_element_type=jnp.float32)
        feat = feat + bias_ref[...]
        feat_ref[...] = feat.astype(feat_ref.dtype)

        # ReLU + rsqrt-based row normalization (EUP), stash bf16 rows for the
        # cosine matmul across all class tiles of this row tile.
        h = jnp.maximum(feat, 0.0)
        sumsq = jnp.sum(h * h, axis=-1, keepdims=True)
        hn_ref[...] = (h * jax.lax.rsqrt(jnp.maximum(sumsq, 1e-24))
                       ).astype(hn_ref.dtype)

    # ---- cosine = h_n @ w_arc_n.T  (weight pre-normalized + pre-transposed) --
    cosine = jnp.dot(hn_ref[...], warc_t_ref[...],
                     preferred_element_type=jnp.float32)

    # ---- per-row arc-margin epilogue ----------------------------------------
    lbl = label_ref[...]                                       # [tm, 1] int32
    tl = out_ref.shape[1]
    cls = jax.lax.broadcasted_iota(jnp.int32, cosine.shape, 1) + j * tl
    one_hot = lbl == cls                                       # padded labels (-1) never match

    # cosine of the label column for this row (0 if label not in this tile).
    cos_lbl = jnp.sum(jnp.where(one_hot, cosine, 0.0), axis=-1, keepdims=True)
    sine_lbl = jnp.sqrt(jnp.maximum(1.0 - cos_lbl * cos_lbl, 0.0))
    phi_lbl = cos_lbl * cos_m - sine_lbl * sin_m
    if easy_margin:
        phi_lbl = jnp.where(cos_lbl > 0.0, phi_lbl, cos_lbl)
    else:
        phi_lbl = jnp.where(cos_lbl > th, phi_lbl, cos_lbl - mm)
    delta = (phi_lbl - cos_lbl) * s                            # [tm, 1]

    out_ref[...] = (cosine * s + jnp.where(one_hot, delta, 0.0)
                    ).astype(out_ref.dtype)


# ------------------------------ pallas wrapper -------------------------------

def _arc_margin_pallas(x, x_agg, w_self, w_neigh, bias, w_arc, label,
                       *, s, m, easy_margin, row_tile=256, class_tile=256):
    n, n_in = x.shape
    d = w_self.shape[1]
    n_labels = w_arc.shape[0]

    cos_m, sin_m = math.cos(m), math.sin(m)
    th = math.cos(math.pi - m)
    mm_ = math.sin(math.pi - m) * m

    # Lane-dense padding: feature / class dims -> multiples of 128.
    # Rows padded to the tile (multiple of 16 so bf16 tiles stay native).
    tm = min(row_tile, _round_up(n, 16))
    n_pad = _round_up(n, tm)
    in_pad = _round_up(n_in, 128)
    d_pad = _round_up(d, 128)
    l_pad128 = _round_up(n_labels, 128)
    tl = min(class_tile, l_pad128)
    l_pad = _round_up(l_pad128, tl)

    # bf16 operands for the MXU; f32 accumulation happens in-kernel.
    xp = jnp.pad(x, ((0, n_pad - n), (0, in_pad - n_in))).astype(jnp.bfloat16)
    xap = jnp.pad(x_agg, ((0, n_pad - n), (0, in_pad - n_in))).astype(jnp.bfloat16)
    wsp = jnp.pad(w_self, ((0, in_pad - n_in), (0, d_pad - d))).astype(jnp.bfloat16)
    wnp_ = jnp.pad(w_neigh, ((0, in_pad - n_in), (0, d_pad - d))).astype(jnp.bfloat16)
    bp = jnp.pad(bias.reshape(1, -1), ((0, 0), (0, d_pad - d)))  # f32

    # Hoisted out of the kernel: normalize arc-weight rows once (f32, clamped so
    # zero / padded rows stay exactly zero), pad, transpose to [K, N], cast bf16.
    w32 = w_arc.astype(jnp.float32)
    w_sumsq = jnp.sum(w32 * w32, axis=-1, keepdims=True)
    w_n = w32 * jax.lax.rsqrt(jnp.maximum(w_sumsq, 1e-24))
    w_nt = jnp.pad(w_n, ((0, l_pad - n_labels), (0, d_pad - d))).T.astype(jnp.bfloat16)

    lp = jnp.pad(label.astype(jnp.int32), (0, n_pad - n),
                 constant_values=-1).reshape(-1, 1)

    # VMEM budget (double-buffered blocks + scratch), with headroom; capped at
    # 64 MiB so the same setting is valid on v7x as well as v5e/v6e.
    vmem_needed = 2 * (
        2 * tm * in_pad * 2          # x, x_agg tiles (bf16)
        + 2 * in_pad * d_pad * 2     # W_self, W_neigh (bf16, resident)
        + d_pad * 4                  # bias (f32)
        + d_pad * tl * 2             # arc-weight class tile (bf16)
        + tm * 4                     # labels
        + tm * d_pad * 4             # feat output tile (f32)
        + tm * tl * 4                # logits output tile (f32)
    ) + tm * d_pad * 2               # h_n scratch (bf16, single)
    vmem_limit = int(min(64 * 1024 * 1024,
                         max(32 * 1024 * 1024, 2 * vmem_needed)))

    kern = partial(_arc_margin_kernel, s=float(s), cos_m=cos_m, sin_m=sin_m,
                   th=th, mm=mm_, easy_margin=bool(easy_margin))

    feat_p, out_p = pl.pallas_call(
        kern,
        out_shape=(jax.ShapeDtypeStruct((n_pad, d_pad), jnp.float32),
                   jax.ShapeDtypeStruct((n_pad, l_pad), jnp.float32)),
        grid=(n_pad // tm, l_pad // tl),
        in_specs=[
            pl.BlockSpec((tm, in_pad), lambda i, j: (i, 0)),      # x tile
            pl.BlockSpec((tm, in_pad), lambda i, j: (i, 0)),      # aggregated x tile
            # Resident weights (constant index_map -> DMA'd once).  A
            # pipeline_mode=pl.Buffered(1) here would also single-buffer them;
            # left at the default for portability across jax versions.
            pl.BlockSpec((in_pad, d_pad), lambda i, j: (0, 0)),   # W_self
            pl.BlockSpec((in_pad, d_pad), lambda i, j: (0, 0)),   # W_neigh
            pl.BlockSpec((1, d_pad), lambda i, j: (0, 0)),        # bias
            pl.BlockSpec((d_pad, tl), lambda i, j: (0, j)),       # normalized arc weight.T tile
            pl.BlockSpec((tm, 1), lambda i, j: (i, 0)),           # labels tile
        ],
        out_specs=(
            pl.BlockSpec((tm, d_pad), lambda i, j: (i, 0)),       # feat (written at j==0)
            pl.BlockSpec((tm, tl), lambda i, j: (i, j)),          # scaled arc logits
        ),
        scratch_shapes=[pltpu.VMEM((tm, d_pad), jnp.bfloat16)],   # normalized rows
        compiler_params=pltpu.CompilerParams(
            dimension_semantics=("parallel", "arbitrary"),
            vmem_limit_bytes=vmem_limit),
    )(xp, xap, wsp, wnp_, bp, w_nt, lp)

    return feat_p[:n, :d], out_p[:n, :n_labels]


# ----------------------- SAGEConv neighbor aggregation -----------------------

def _sage_mean_aggregate(x, edge_index):
    # TODO(synk): data-dependent gather/scatter over edge_index has no clean
    # Pallas equivalent at this scale; done with XLA segment_sum instead.
    src, dst = edge_index[0], edge_index[1]
    n = x.shape[0]
    msg_sum = jax.ops.segment_sum(x[src], dst, num_segments=n)
    deg = jax.ops.segment_sum(jnp.ones((src.shape[0],), x.dtype), dst,
                              num_segments=n)
    return msg_sum / jnp.maximum(deg, 1.0)[:, None]


@partial(jax.jit, static_argnames=("s", "m", "easy_margin", "row_tile",
                                   "class_tile"))
def arc_margin_product_forward(x, edge_index, label, w_self, w_neigh, bias,
                               w_arc, *, s, m, easy_margin=False,
                               row_tile=256, class_tile=256):
    x_agg = _sage_mean_aggregate(x, edge_index)
    return _arc_margin_pallas(x, x_agg, w_self, w_neigh, bias, w_arc, label,
                              s=s, m=m, easy_margin=easy_margin,
                              row_tile=row_tile, class_tile=class_tile)


# ------------------------------- module wrapper -------------------------------

class ArcMarginProduct:
    """JAX/Pallas port of sodirac.model.ArcMarginProduct (forward pass)."""

    def __init__(self, n_inputs, n_labels, n_outputs=32, s=64.0, m=0.2,
                 easy_margin=False, *, key):
        def xavier(k, shape):
            lim = math.sqrt(6.0 / (shape[0] + shape[1]))
            return jax.random.uniform(k, shape, jnp.float32, -lim, lim)

        k1, k2, k3 = jax.random.split(key, 3)
        self.w_self = xavier(k1, (n_inputs, n_outputs))     # SAGEConv root weight
        self.w_neigh = xavier(k2, (n_inputs, n_outputs))    # SAGEConv neighbor weight
        self.bias = jnp.zeros((n_outputs,), jnp.float32)
        self.w_arc = xavier(k3, (n_labels, n_outputs))      # arc-margin class weights
        self.s, self.m, self.easy_margin = float(s), float(m), bool(easy_margin)

    def __call__(self, x, edge_index, label):
        return arc_margin_product_forward(
            x, edge_index, label, self.w_self, self.w_neigh, self.bias,
            self.w_arc, s=self.s, m=self.m, easy_margin=self.easy_margin)


# --------------------------------- reference ----------------------------------

def _reference(x, x_agg, w_self, w_neigh, bias, w_arc, label, *, s, m,
               easy_margin=False):
    feat = x @ w_self + x_agg @ w_neigh + bias
    h = jnp.maximum(feat, 0.0)
    h_n = h / jnp.maximum(jnp.linalg.norm(h, axis=-1, keepdims=True), 1e-12)
    w_n = w_arc / jnp.maximum(jnp.linalg.norm(w_arc, axis=-1, keepdims=True), 1e-12)
    cosine = h_n @ w_n.T
    sine = jnp.sqrt(jnp.clip(1.0 - cosine ** 2, 0.0, 1.0))
    cos_m, sin_m = math.cos(m), math.sin(m)
    th, mm_ = math.cos(math.pi - m), math.sin(math.pi - m) * m
    phi = cosine * cos_m - sine * sin_m
    phi = (jnp.where(cosine > 0, phi, cosine) if easy_margin
           else jnp.where(cosine > th, phi, cosine - mm_))
    one_hot = jax.nn.one_hot(label, w_arc.shape[0], dtype=cosine.dtype)
    out = (one_hot * phi + (1.0 - one_hot) * cosine) * s
    return feat, out


# ------------------------------------ main ------------------------------------

if __name__ == "__main__":
    key = jax.random.PRNGKey(0)
    kx, kl, kw = jax.random.split(key, 3)

    N, n_inputs, n_outputs, n_labels = 16, 32, 32, 10
    s, m = 64.0, 0.2

    x = jax.random.normal(kx, (N, n_inputs), dtype=jnp.float32)
    # Deterministic small graph: bidirectional ring.
    src = jnp.arange(N, dtype=jnp.int32)
    dst = (src + 1) % N
    edge_index = jnp.stack([jnp.concatenate([src, dst]),
                            jnp.concatenate([dst, src])], axis=0)
    label = jax.random.randint(kl, (N,), 0, n_labels, dtype=jnp.int32)

    mod = ArcMarginProduct(n_inputs, n_labels, n_outputs=n_outputs,
                           s=s, m=m, easy_margin=False, key=kw)

    feat, out = mod(x, edge_index, label)
    feat, out = jax.block_until_ready((feat, out))

    assert feat.shape == (N, n_outputs) and out.shape == (N, n_labels)
    assert feat.dtype == jnp.float32 and out.dtype == jnp.float32

    x_agg = _sage_mean_aggregate(x, edge_index)
    feat_exp, out_exp = _reference(x, x_agg, mod.w_self, mod.w_neigh, mod.bias,
                                   mod.w_arc, label, s=s, m=m, easy_margin=False)
    # bf16 matmul operands -> slightly looser tolerances than a pure-f32 path.
    assert bool(jnp.allclose(feat, feat_exp, atol=1e-1, rtol=1e-2))
    assert bool(jnp.allclose(out, out_exp, atol=5e-1, rtol=1e-2))

    print("KERNEL_OK")
</pallas_src>

<mosaic_0001>
module attributes {stable_mosaic.version = 11 : i64} {
  func.func private @main(%arg0: i32) attributes {dimension_semantics = [#tpu.dimension_semantics<core_parallel>], iteration_bounds = array<i64: 2>, tpu.core_type = #tpu.core_type<sc_scalar_subcore>, window_params = []} {
    return
  }
}

module attributes {stable_mosaic.version = 11 : i64} {
  func.func private @main(%arg0: i32) attributes {dimension_semantics = [#tpu.dimension_semantics<core_parallel>], iteration_bounds = array<i64: 2>, tpu.core_type = #tpu.core_type<sc_scalar_subcore>, window_params = []} {
    return
  }
}

module attributes {stable_mosaic.version = 11 : i64} {
  func.func @_arc_margin_kernel(%arg0: i32, %arg1: i32, %arg2: memref<16x128xbf16, #tpu.memory_space<vmem>>, %arg3: memref<16x128xbf16, #tpu.memory_space<vmem>>, %arg4: memref<128x128xbf16, #tpu.memory_space<vmem>>, %arg5: memref<128x128xbf16, #tpu.memory_space<vmem>>, %arg6: memref<1x128xf32, #tpu.memory_space<vmem>>, %arg7: memref<128x128xbf16, #tpu.memory_space<vmem>>, %arg8: memref<16x1xi32, #tpu.memory_space<vmem>>, %arg9: memref<16x128xf32, #tpu.memory_space<vmem>>, %arg10: memref<16x128xf32, #tpu.memory_space<vmem>>, %arg11: memref<16x128xbf16, #tpu.memory_space<vmem>>) attributes {dimension_semantics = [#tpu.dimension_semantics<parallel>, #tpu.dimension_semantics<arbitrary>], iteration_bounds = array<i64: 1, 1>, scalar_prefetch = 0 : i64, scratch_operands = 1 : i64, tpu.core_type = #tpu.core_type<tc>, window_params = [{transform_indices = @transform_0, window_bounds = array<i64: 16, 128>}, {transform_indices = @transform_1, window_bounds = array<i64: 16, 128>}, {pipeline_mode = #tpu.pipeline_mode<synchronous>, transform_indices = @transform_2, window_bounds = array<i64: 128, 128>}, {pipeline_mode = #tpu.pipeline_mode<synchronous>, transform_indices = @transform_3, window_bounds = array<i64: 128, 128>}, {pipeline_mode = #tpu.pipeline_mode<synchronous>, transform_indices = @transform_4, window_bounds = array<i64: 1, 128>}, {transform_indices = @transform_5, window_bounds = array<i64: 128, 128>}, {transform_indices = @transform_6, window_bounds = array<i64: 16, 1>}, {transform_indices = @transform_7, window_bounds = array<i64: 16, 128>}, {transform_indices = @transform_8, window_bounds = array<i64: 16, 128>}]} {
    %c0_i32 = arith.constant 0 : i32
    %0 = arith.cmpi eq, %arg1, %c0_i32 : i32
    %1 = arith.extui %0 : i1 to i32
    %c0_i32_0 = arith.constant 0 : i32
    %2 = arith.cmpi ne, %1, %c0_i32_0 : i32
    scf.if %2 {
      %c0_19 = arith.constant 0 : index
      %c0_20 = arith.constant 0 : index
      %44 = vector.load %arg2[%c0_19, %c0_20] : memref<16x128xbf16, #tpu.memory_space<vmem>>, vector<16x128xbf16>
      %c0_21 = arith.constant 0 : index
      %c0_22 = arith.constant 0 : index
      %45 = vector.load %arg4[%c0_21, %c0_22] : memref<128x128xbf16, #tpu.memory_space<vmem>>, vector<128x128xbf16>
      %cst_23 = arith.constant dense<0.000000e+00> : vector<16x128xf32>
      %46 = tpu.matmul %44, %45, %cst_23 {dimension_numbers = #tpu.dot_dimension_numbers<[1], [0], [0], [1], [0, 0, 1, 1], [], []>} : vector<16x128xbf16>, vector<128x128xbf16>, vector<16x128xf32> -> vector<16x128xf32>
      %c0_24 = arith.constant 0 : index
      %c0_25 = arith.constant 0 : index
      %47 = vector.load %arg3[%c0_24, %c0_25] : memref<16x128xbf16, #tpu.memory_space<vmem>>, vector<16x128xbf16>
      %c0_26 = arith.constant 0 : index
      %c0_27 = arith.constant 0 : index
      %48 = vector.load %arg5[%c0_26, %c0_27] : memref<128x128xbf16, #tpu.memory_space<vmem>>, vector<128x128xbf16>
      %cst_28 = arith.constant dense<0.000000e+00> : vector<16x128xf32>
      %49 = tpu.matmul %47, %48, %cst_28 {dimension_numbers = #tpu.dot_dimension_numbers<[1], [0], [0], [1], [0, 0, 1, 1], [], []>} : vector<16x128xbf16>, vector<128x128xbf16>, vector<16x128xf32> -> vector<16x128xf32>
      %50 = arith.addf %46, %49 : vector<16x128xf32>
      %c0_29 = arith.constant 0 : index
      %c0_30 = arith.constant 0 : index
      %51 = vector.load %arg6[%c0_29, %c0_30] : memref<1x128xf32, #tpu.memory_space<vmem>>, vector<1x128xf32>
      %52 = vector.broadcast %51 : vector<1x128xf32> to vector<16x128xf32>
      %53 = arith.addf %50, %52 : vector<16x128xf32>
      %c0_31 = arith.constant 0 : index
      %c0_32 = arith.constant 0 : index
      %54 = vector.load %arg9[%c0_31, %c0_32] : memref<16x128xf32, #tpu.memory_space<vmem>>, vector<16x128xf32>
      tpu.vector_store %arg9[%c0_31, %c0_32], %53 {strides = array<i32>} : memref<16x128xf32, #tpu.memory_space<vmem>>, vector<16x128xf32>,
      %cst_33 = arith.constant 0.000000e+00 : f32
      %55 = vector.broadcast %cst_33 : f32 to vector<16x128xf32>
      %56 = arith.maximumf %53, %55 : vector<16x128xf32>
      %57 = arith.mulf %56, %56 : vector<16x128xf32>
      %cst_34 = arith.constant dense<0.000000e+00> : vector<16xf32>
      %58 = vector.multi_reduction <add>, %57, %cst_34 [1] : vector<16x128xf32> to vector<16xf32>
      %59 = vector.shape_cast %58 : vector<16xf32> to vector<16x1xf32>
      %cst_35 = arith.constant 1.000000e-24 : f32
      %60 = vector.broadcast %cst_35 : f32 to vector<16x1xf32>
      %61 = arith.maximumf %59, %60 : vector<16x1xf32>
      %62 = math.rsqrt %61 : vector<16x1xf32>
      %63 = vector.broadcast %62 : vector<16x1xf32> to vector<16x128xf32>
      %64 = arith.mulf %56, %63 : vector<16x128xf32>
      %65 = arith.truncf %64 : vector<16x128xf32> to vector<16x128xbf16>
      %c0_36 = arith.constant 0 : index
      %c0_37 = arith.constant 0 : index
      %66 = vector.load %arg11[%c0_36, %c0_37] : memref<16x128xbf16, #tpu.memory_space<vmem>>, vector<16x128xbf16>
      tpu.vector_store %arg11[%c0_36, %c0_37], %65 {strides = array<i32>} : memref<16x128xbf16, #tpu.memory_space<vmem>>, vector<16x128xbf16>,
    } else {
    }
    %c0 = arith.constant 0 : index
    %c0_1 = arith.constant 0 : index
    %3 = vector.load %arg11[%c0, %c0_1] : memref<16x128xbf16, #tpu.memory_space<vmem>>, vector<16x128xbf16>
    %c0_2 = arith.constant 0 : index
    %c0_3 = arith.constant 0 : index
    %4 = vector.load %arg7[%c0_2, %c0_3] : memref<128x128xbf16, #tpu.memory_space<vmem>>, vector<128x128xbf16>
    %cst = arith.constant dense<0.000000e+00> : vector<16x128xf32>
    %5 = tpu.matmul %3, %4, %cst {dimension_numbers = #tpu.dot_dimension_numbers<[1], [0], [0], [1], [0, 0, 1, 1], [], []>} : vector<16x128xbf16>, vector<128x128xbf16>, vector<16x128xf32> -> vector<16x128xf32>
    %c0_4 = arith.constant 0 : index
    %c0_5 = arith.constant 0 : index
    %6 = vector.load %arg8[%c0_4, %c0_5] : memref<16x1xi32, #tpu.memory_space<vmem>>, vector<16x1xi32>
    %7 = tpu.iota {dimensions = array<i32: 1>} : vector<16x128xi32>
    %c128_i32 = arith.constant 128 : i32
    %8 = arith.muli %arg1, %c128_i32 : i32
    %9 = vector.broadcast %8 : i32 to vector<16x128xi32>
    %10 = arith.addi %7, %9 : vector<16x128xi32>
    %11 = vector.broadcast %6 : vector<16x1xi32> to vector<16x128xi32>
    %12 = arith.cmpi eq, %11, %10 : vector<16x128xi32>
    %cst_6 = arith.constant 0.000000e+00 : f32
    %13 = vector.broadcast %cst_6 : f32 to vector<16x128xf32>
    %14 = arith.select %12, %5, %13 : vector<16x128xi1>, vector<16x128xf32>
    %cst_7 = arith.constant dense<0.000000e+00> : vector<16xf32>
    %15 = vector.multi_reduction <add>, %14, %cst_7 [1] : vector<16x128xf32> to vector<16xf32>
    %16 = vector.shape_cast %15 : vector<16xf32> to vector<16x1xf32>
    %17 = arith.mulf %16, %16 : vector<16x1xf32>
    %cst_8 = arith.constant 1.000000e+00 : f32
    %18 = vector.broadcast %cst_8 : f32 to vector<16x1xf32>
    %19 = arith.subf %18, %17 : vector<16x1xf32>
    %cst_9 = arith.constant 0.000000e+00 : f32
    %20 = vector.broadcast %cst_9 : f32 to vector<16x1xf32>
    %21 = arith.maximumf %19, %20 : vector<16x1xf32>
    %22 = math.sqrt %21 : vector<16x1xf32>
    %cst_10 = arith.constant 0.980066597 : f32
    %23 = vector.broadcast %cst_10 : f32 to vector<16x1xf32>
    %24 = arith.mulf %16, %23 : vector<16x1xf32>
    %cst_11 = arith.constant 0.198669329 : f32
    %25 = vector.broadcast %cst_11 : f32 to vector<16x1xf32>
    %26 = arith.mulf %22, %25 : vector<16x1xf32>
    %27 = arith.subf %24, %26 : vector<16x1xf32>
    %cst_12 = arith.constant -0.980066597 : f32
    %28 = vector.broadcast %cst_12 : f32 to vector<16x1xf32>
    %29 = arith.cmpf ogt, %16, %28 : vector<16x1xf32>
    %cst_13 = arith.constant 0.0397338644 : f32
    %30 = vector.broadcast %cst_13 : f32 to vector<16x1xf32>
    %31 = arith.subf %16, %30 : vector<16x1xf32>
    %32 = arith.select %29, %27, %31 : vector<16x1xi1>, vector<16x1xf32>
    %33 = arith.subf %32, %16 : vector<16x1xf32>
    %cst_14 = arith.constant 6.400000e+01 : f32
    %34 = vector.broadcast %cst_14 : f32 to vector<16x1xf32>
    %35 = arith.mulf %33, %34 : vector<16x1xf32>
    %cst_15 = arith.constant 6.400000e+01 : f32
    %36 = vector.broadcast %cst_15 : f32 to vector<16x128xf32>
    %37 = arith.mulf %5, %36 : vector<16x128xf32>
    %cst_16 = arith.constant 0.000000e+00 : f32
    %38 = vector.shape_cast %35 : vector<16x1xf32> to vector<16x1xf32>
    %39 = vector.broadcast %38 : vector<16x1xf32> to vector<16x128xf32>
    %40 = vector.broadcast %cst_16 : f32 to vector<16x128xf32>
    %41 = arith.select %12, %39, %40 : vector<16x128xi1>, vector<16x128xf32>
    %42 = arith.addf %37, %41 : vector<16x128xf32>
    %c0_17 = arith.constant 0 : index
    %c0_18 = arith.constant 0 : index
    %43 = vector.load %arg10[%c0_17, %c0_18] : memref<16x128xf32, #tpu.memory_space<vmem>>, vector<16x128xf32>
    tpu.vector_store %arg10[%c0_17, %c0_18], %42 {strides = array<i32>} : memref<16x128xf32, #tpu.memory_space<vmem>>, vector<16x128xf32>,
    return
  }
  func.func @transform_0(%arg0: i32, %arg1: i32) -> (i32, i32) {
    %c0_i32 = arith.constant 0 : i32
    %c0_i32_0 = arith.constant 0 : i32
    return %arg0, %c0_i32 : i32, i32
  }
  func.func @transform_1(%arg0: i32, %arg1: i32) -> (i32, i32) {
    %c0_i32 = arith.constant 0 : i32
    %c0_i32_0 = arith.constant 0 : i32
    return %arg0, %c0_i32 : i32, i32
  }
  func.func @transform_2(%arg0: i32, %arg1: i32) -> (i32, i32) {
    %c0_i32 = arith.constant 0 : i32
    %c0_i32_0 = arith.constant 0 : i32
    %c0_i32_1 = arith.constant 0 : i32
    return %c0_i32, %c0_i32_0 : i32, i32
  }
  func.func @transform_3(%arg0: i32, %arg1: i32) -> (i32, i32) {
    %c0_i32 = arith.constant 0 : i32
    %c0_i32_0 = arith.constant 0 : i32
    %c0_i32_1 = arith.constant 0 : i32
    return %c0_i32, %c0_i32_0 : i32, i32
  }
  func.func @transform_4(%arg0: i32, %arg1: i32) -> (i32, i32) {
    %c0_i32 = arith.constant 0 : i32
    %c0_i32_0 = arith.constant 0 : i32
    %c0_i32_1 = arith.constant 0 : i32
    return %c0_i32, %c0_i32_0 : i32, i32
  }
  func.func @transform_5(%arg0: i32, %arg1: i32) -> (i32, i32) {
    %c0_i32 = arith.constant 0 : i32
    %c0_i32_0 = arith.constant 0 : i32
    return %c0_i32, %arg1 : i32, i32
  }
  func.func @transform_6(%arg0: i32, %arg1: i32) -> (i32, i32) {
    %c0_i32 = arith.constant 0 : i32
    %c0_i32_0 = arith.constant 0 : i32
    return %arg0, %c0_i32 : i32, i32
  }
  func.func @transform_7(%arg0: i32, %arg1: i32) -> (i32, i32) {
    %c0_i32 = arith.constant 0 : i32
    %c0_i32_0 = arith.constant 0 : i32
    return %arg0, %c0_i32 : i32, i32
  }
  func.func @transform_8(%arg0: i32, %arg1: i32) -> (i32, i32) {
    %c0_i32 = arith.constant 0 : i32
    return %arg0, %arg1 : i32, i32
  }
}

</mosaic_0001>

<bundles_post_ra>
// kernel: arc_margin_product_forward.1
= control target key start
LH: loop header
LB: loop body
LE: loop exit
PB: predicated region body
PF: predicated region fallthrough
CT: control target
= control target key end

     0   :  { %14 = vsyncpa [#allocation4], 0  ;;  %v720_v1 = vmov 0.0   ;;  %vm721_vm0 = vmmov 0   ;;  %s923_s0 = inlined_call_operand.vmem [shape: bf16[16,128], index: 0, kind: input, shape index: {}]   ;;  %s924_s1 = inlined_call_operand.vmem [shape: bf16[16,128], index: 1, kind: input, shape index: {}]   ;;  %s925_s2 = inlined_call_operand.vmem [shape: bf16[128,128], index: 2, kind: input, shape index: {}]   ;;  %s926_s3 = inlined_call_operand.vmem [shape: bf16[128,128], index: 3, kind: input, shape index: {}]   ;;  %s927_s4 = inlined_call_operand.vmem [shape: f32[1,128], index: 4, kind: input, shape index: {}]   ;;  %s928_s5 = inlined_call_operand.vmem [shape: bf16[128,128], index: 5, kind: input, shape index: {}]   ;;  %s929_s6 = inlined_call_operand.vmem [shape: s32[16,1], index: 6, kind: input, shape index: {}]   ;;  %s930_s7 = inlined_call_operand.hbm [shape: f32[16,128], index: 7, kind: output, shape index: {0}]   ;;  %s931_s8 = inlined_call_operand.hbm [shape: f32[16,128], index: 8, kind: output, shape index: {1}]  }
   0x1   :  { %v641_v0 = vld [vmem:[%s926_s3 + $0x38] sm:$0xff]   ;;  %572 = vmatprep.subr.bf16.mxu0 %v720_v1  ;;  %592 = vmatprep.subr.bf16.mxu1 %v720_v1  ;;  %v643_v3 = vld [vmem:[%s926_s3 + $0x30] sm:$0xff]   ;;  %v645_v5 = vld [vmem:[%s926_s3 + $0x28] sm:$0xff]  }
   0x2   :  { %v642_v2 = vld [vmem:[%s925_s2 + $0x38] sm:$0xff]   ;;  %573 = vmatpush3.bf16.msra.mxu0 %v641_v0  ;;  %588 = vmatprep.mubr.msk.bf16.mxu0 %vm721_vm0, %v720_v1  ;;  %v644_v4 = vld [vmem:[%s925_s2 + $0x30] sm:$0xff]   ;;  %v646_v6 = vld [vmem:[%s925_s2 + $0x28] sm:$0xff]  }
   0x3   :  { %593 = vmatpush3.bf16.msra.mxu1 %v642_v2  ;;  %574 = vmatprep.subr.bf16.mxu0 %v720_v1  ;;  %v647_v7 = vld [vmem:[%s926_s3 + $0x20] sm:$0xff]   ;;  %v649_v9 = vld [vmem:[%s926_s3 + $0x18] sm:$0xff]   ;;  %v651_v11 = vld [vmem:[%s926_s3 + $0x10] sm:$0xff]  }
   0x4   :  { %594 = vmatprep.subr.bf16.mxu1 %v720_v1  ;;  %608 = vmatprep.mubr.msk.bf16.mxu1 %vm721_vm0, %v720_v1  ;;  %v648_v8 = vld [vmem:[%s925_s2 + $0x20] sm:$0xff]   ;;  %v650_v10 = vld [vmem:[%s925_s2 + $0x18] sm:$0xff]   ;;  %v652_v12 = vld [vmem:[%s925_s2 + $0x10] sm:$0xff]  }
   0x5   :  { %v653_v13 = vld [vmem:[%s926_s3 + $0x8] sm:$0xff]  }
   0x6   :  { %575 = vmatpush3.bf16.msra.mxu0 %v643_v3  ;;  %v654_v14 = vld [vmem:[%s925_s2 + $0x8] sm:$0xff]  }
   0x7   :  { %595 = vmatpush3.bf16.msra.mxu1 %v644_v4  ;;  %576 = vmatprep.subr.bf16.mxu0 %v720_v1 }
   0x8   :  { %596 = vmatprep.subr.bf16.mxu1 %v720_v1 }
   0xa   :  { %577 = vmatpush3.bf16.msra.mxu0 %v645_v5 }
   0xb   :  { %597 = vmatpush3.bf16.msra.mxu1 %v646_v6  ;;  %578 = vmatprep.subr.bf16.mxu0 %v720_v1 }
   0xc   :  { %598 = vmatprep.subr.bf16.mxu1 %v720_v1 }
   0xe   :  { %579 = vmatpush3.bf16.msra.mxu0 %v647_v7 }
   0xf   :  { %599 = vmatpush3.bf16.msra.mxu1 %v648_v8  ;;  %580 = vmatprep.subr.bf16.mxu0 %v720_v1 }
  0x10   :  { %600 = vmatprep.subr.bf16.mxu1 %v720_v1 }
  0x12   :  { %581 = vmatpush3.bf16.msra.mxu0 %v649_v9 }
  0x13   :  { %601 = vmatpush3.bf16.msra.mxu1 %v650_v10  ;;  %582 = vmatprep.subr.bf16.mxu0 %v720_v1 }
  0x14   :  { %602 = vmatprep.subr.bf16.mxu1 %v720_v1 }
  0x16   :  { %583 = vmatpush3.bf16.msra.mxu0 %v651_v11 }
  0x17   :  { %603 = vmatpush3.bf16.msra.mxu1 %v652_v12  ;;  %584 = vmatprep.subr.bf16.mxu0 %v720_v1 }
  0x18   :  { %15 = vsyncpa [#allocation6], 0  ;;  %604 = vmatprep.subr.bf16.mxu1 %v720_v1  ;;  %v655_v15 = vld [vmem:[%s926_s3] sm:$0xff]   ;;  %v659_v36 = vld [vmem:[%s928_s5 + $0x38] sm:$0xff]   ;;  %v722_v45 = vmov 0   ;;  %v411_v57 = vlaneseq }
  0x19   :  { %v656_v16 = vld [vmem:[%s925_s2] sm:$0xff]   ;;  %v660_v37 = vld [vmem:[%s928_s5 + $0x30] sm:$0xff]   ;;  %v661_v38 = vld [vmem:[%s928_s5 + $0x28] sm:$0xff]   ;;  %639 = vset.pattern.permute.xlu1 %v722_v45  ;;  %640 = vset.pattern.permute.xlu0 %v722_v45 }
  0x1a   :  { %585 = vmatpush3.bf16.msra.mxu0 %v653_v13  ;;  %v657_v17 = vld [vmem:[%s924_s1] sm:$0xff]   ;;  %v663_v40 = vld [vmem:[%s928_s5 + $0x18] sm:$0xff]   ;;  %v664_v41 = vld [vmem:[%s928_s5 + $0x10] sm:$0xff]   ;;  %v889_v58 = vand.u32 127, %v411_v57 }
  0x1b   :  { %605 = vmatpush3.bf16.msra.mxu1 %v654_v14  ;;  %586 = vmatprep.subr.bf16.mxu0 %v720_v1  ;;  %v658_v18 = vld [vmem:[%s923_s0] sm:$0xff]   ;;  %v665_v42 = vld [vmem:[%s928_s5 + $0x8] sm:$0xff]  }
  0x1c   :  { %606 = vmatprep.subr.bf16.mxu1 %v720_v1  ;;  %v524_v21 = vld [vmem:[%s927_s4] ss:$0 sm:$0xff]  ;;  %v410_v46 = vld [vmem:[%s929_s6 + $0x8] sm:$0xff] }
  0x1d   :  { %v662_v39 = vld [vmem:[%s928_s5 + $0x20] sm:$0xff]  }
  0x1e   :  { %587 = vmatpush3.bf16.msra.mxu0 %v655_v15  ;;  %v666_v43 = vld [vmem:[%s928_s5] sm:$0xff]   ;;  %s723_s5 = smov [#allocation3]  }
  0x1f   :  { %607 = vmatpush3.bf16.msra.mxu1 %v656_v16  ;;  %612 = vmatprep.subr.bf16.mxu0 %v720_v1  ;;  %v409_v44 = vld [vmem:[%s929_s6] sm:$0xff]  ;;  %s479_s6 = sshll.u32 %s723_s5, 4  ;;  %s480_s6 = int_to_ptr.vmem [resolvable:$true] %s479_s6 }
  0x20   :  { %417 = vperm.xlu1 %639, %v409_v44   ;;  %s676_s14 = scalar_lea.vmem %s480_s6, 256  ;;  %p681_p1 = scmp.lt.s32.totalorder %s480_s6, %s480_s6 }
  0x21   :  { %589 = vmatmul.mubr.bf16.vlgmr.msra.gmra.mxu0 %v657_v17  ;;  %p677_p0 = scmp.ne.s32.totalorder %s480_s6, %s676_s14  ;;  %p682_p2 = scmp.lt.s32.totalorder %s676_s14, %s676_s14 }
  0x22   :  { %609 = vmatmul.mubr.bf16.vlgmr.msra.gmra.mxu1 %v658_v18  ;;  %628 = vmatprep.mubr.msk.bf16.mxu0 %vm721_vm0, %v720_v1 }
  0x23   :  { %613 = vmatpush3.bf16.msra.mxu0 %v659_v36  ;;  %p683_p3 = por %p682_p2, %p681_p1 }
  0x24   :  { %614 = vmatprep.subr.bf16.mxu0 %v720_v1  ;;  %420 = vperm.xlu1 %639, %v410_v46  }
  0x25   :  { %p684_p4 = pnand %p683_p3, %p677_p0 }
  0x27   :  { %615 = vmatpush3.bf16.msra.mxu0 %v660_v37 }
  0x28   :  { %616 = vmatprep.subr.bf16.mxu0 %v720_v1 }
  0x2b   :  { %617 = vmatpush3.bf16.msra.mxu0 %v661_v38 }
  0x2c   :  { %618 = vmatprep.subr.bf16.mxu0 %v720_v1 }
  0x2f   :  { %619 = vmatpush3.bf16.msra.mxu0 %v662_v39 }
  0x30   :  { %620 = vmatprep.subr.bf16.mxu0 %v720_v1 }
  0x33   :  { %621 = vmatpush3.bf16.msra.mxu0 %v663_v40 }
  0x34   :  { %622 = vmatprep.subr.bf16.mxu0 %v720_v1 }
  0x37   :  { %623 = vmatpush3.bf16.msra.mxu0 %v664_v41 }
  0x38   :  { %624 = vmatprep.subr.bf16.mxu0 %v720_v1 }
  0x3b   :  { %625 = vmatpush3.bf16.msra.mxu0 %v665_v42 }
  0x3c   :  { %626 = vmatprep.subr.bf16.mxu0 %v720_v1 }
  0x3f   :  { %627 = vmatpush3.bf16.msra.mxu0 %v666_v43 }
  0x9b   :  { %v891_v59 = vpop.permute.xlu1 %417 }
  0x9c   :  { %vm422_vm1 = vcmp.eq.s32.totalorder %v891_v59, %v889_v58 }
  0x9f   :  { %v895_v61 = vpop.permute.xlu1 %420 }
  0xa0   :  { %vm423_vm2 = vcmp.eq.s32.totalorder %v895_v61, %v889_v58 }
  0xe1   :  { %v159_v19 = vpop.f32.mrf.mxu0 }
  0xe2   :  { %v254_v20 = vpop.f32.mrf.mxu1 }
  0xe3   :  { %v255_v22 = vadd.f32 %v254_v20, %v159_v19  ;;  %v590_v23 = vpop.f32.mrf.mxu0 }
  0xe4   :  { %v610_v24 = vpop.f32.mrf.mxu1 }
  0xe5   :  { %v268_v25 = vadd.f32 %v524_v21, %v255_v22  ;;  %v162_v26 = vpop.f32.mrf.mxu0 }
  0xe6   :  { %v257_v27 = vpop.f32.mrf.mxu1 }
  0xe7   :  { %270 = vst [vmem:[#allocation3] sm:$0xff] %v268_v25  ;;  %v258_v28 = vadd.f32 %v257_v27, %v162_v26  ;;  %v591_v29 = vpop.f32.mrf.mxu0  ;;  %v272_v30 = vmax.f32 %v268_v25, 0.0 }
  0xe8   :  { %v611_v31 = vpop.f32.mrf.mxu1 }
  0xe9   :  { %v269_v32 = vadd.f32 %v524_v21, %v258_v28  ;;  %v274_v33 = vmul.f32 %v272_v30, %v272_v30 }
  0xeb   :  { %271 = vst [vmem:[#allocation3 + $0x8] sm:$0xff] %v269_v32  ;;  %276 = vadd.xlane.f32.xlu0 %v274_v33  ;;  %v273_v34 = vmax.f32 %v269_v32, 0.0 }
  0xed   :  { %v275_v35 = vmul.f32 %v273_v34, %v273_v34 }
  0xef   :  { %278 = vadd.xlane.f32.xlu0 %v275_v35 }
 0x174   :  { %v277_v47 = vpop.xlane.xlu0 %276 }
 0x175   :  { %v280_v48 = vmax.f32 %v277_v47, 1e-24 }
 0x177   :  { %668 = vrsqrt.f32 %v280_v48 }
 0x178   :  { %v279_v49 = vpop.xlane.xlu0 %278 }
 0x179   :  { %v281_v50 = vmax.f32 %v279_v49, 1e-24 }
 0x17b   :  { %670 = vrsqrt.f32 %v281_v50 }
 0x184   :  { %v669_v51 = vpop.eup %668 }
 0x185   :  { %v284_v53 = vmul.f32 %v669_v51, %v272_v30 }
 0x188   :  { %v671_v52 = vpop.eup %670 }
 0x189   :  { %v285_v54 = vmul.f32 %v671_v52, %v273_v34 }
 0x18b   :  { %v543_v55 = vpack.c.bf16 %v285_v54, %v284_v53 }
 0x18d   :  { %544 = vst [vmem:[#allocation2] sm:$0xff] %v543_v55  }
 0x194   :  { %v667_v56 = vld [vmem:[#allocation2] sm:$0xff]  }
 0x195   :  { %629 = vmatmul.mubr.bf16.vlgmr.msra.gmra.mxu0 %v667_v56 }
 0x255   :  { %v402_v60 = vpop.f32.mrf.mxu0 }
 0x256   :  { %v424_v62 = vsel %vm422_vm1, %v402_v60, 0.0 }
 0x257   :  { %426 = vadd.xlane.f32.xlu0 %v424_v62  ;;  %v630_v63 = vpop.f32.mrf.mxu0 }
 0x259   :  { %v405_v0 = vpop.f32.mrf.mxu0 }
 0x25a   :  { %v425_v1 = vsel %vm423_vm2, %v405_v0, 0.0 }
 0x25b   :  { %428 = vadd.xlane.f32.xlu1 %v425_v1  ;;  %v631_v2 = vpop.f32.mrf.mxu0 }
 0x25c   :  { %687 = shalt.err (!%p684_p4)
}
 0x25d   :  { %s724_s15 = smov 128   ;;  %s725_s16 = smov 8   ;;  %v466_v32 = vmul.f32 64.0, %v402_v60  ;;  %v467_v38 = vmul.f32 64.0, %v405_v0 }
 0x25e   :  { %485 = dma.vmem_to_hbm [thread:$0]  %s480_s6, 256, %s930_s7, [#allocation4], %s724_s15, %s724_s15, %s725_s16  }
 0x25f   :  { %s726_s7 = smov [#allocation5]  }
 0x260   :  { %s491_s2 = sshll.u32 %s726_s7, 4  ;;  %s492_s2 = int_to_ptr.vmem [resolvable:$true] %s491_s2 }
 0x261   :  { %s696_s3 = scalar_lea.vmem %s492_s2, 256  ;;  %p701_p6 = scmp.lt.s32.totalorder %s492_s2, %s492_s2 }
 0x262   :  { %p697_p5 = scmp.ne.s32.totalorder %s492_s2, %s696_s3  ;;  %p702_p7 = scmp.lt.s32.totalorder %s696_s3, %s696_s3 }
 0x264   :  { %p703_p8 = por %p702_p7, %p701_p6 }
 0x266   :  { %p704_p9 = pnand %p703_p8, %p697_p5 }
 0x2e0   :  { %v427_v3 = vpop.xlane.xlu0 %426 }
 0x2e1   :  { %v430_v4 = vmul.f32 %v427_v3, %v427_v3  ;;  %v450_v17 = vmul.f32 0.9800666, %v427_v3  ;;  %v536_v21 = vadd.f32 -0.039733864, %v427_v3  ;;  %vm456_vm6 = vcmp.gt.f32.partialorder %v427_v3, -0.9800666 }
 0x2e3   :  { %v432_v5 = vsub.f32 1.0, %v430_v4 }
 0x2e4   :  { %v429_v6 = vpop.xlane.xlu1 %428 }
 0x2e5   :  { %v434_v7 = vmax.f32 %v432_v5, 0.0  ;;  %v431_v8 = vmul.f32 %v429_v6, %v429_v6  ;;  %v451_v27 = vmul.f32 0.9800666, %v429_v6  ;;  %v537_v31 = vadd.f32 -0.039733864, %v429_v6 }
 0x2e6   :  { %vm457_vm8 = vcmp.gt.f32.partialorder %v429_v6, -0.9800666 }
 0x2e7   :  { %672 = vrsqrt.f32 %v434_v7  ;;  %v433_v9 = vsub.f32 1.0, %v431_v8  ;;  %vm438_vm3 = vcmp.eq.f32.partialorder %v434_v7, inf  ;;  %v441_v13 = vand.u32 2147483648, %v434_v7 }
 0x2e8   :  { %vm440_vm4 = vcmp.eq.f32.partialorder %v434_v7, 0.0 }
 0x2e9   :  { %v435_v10 = vmax.f32 %v433_v9, 0.0 }
 0x2eb   :  { %674 = vrsqrt.f32 %v435_v10  ;;  %vm445_vm5 = vcmp.eq.f32.partialorder %v435_v10, inf  ;;  %v448_v22 = vand.u32 2147483648, %v435_v10  ;;  %vm447_vm7 = vcmp.eq.f32.partialorder %v435_v10, 0.0 }
 0x2f4   :  { %v673_v11 = vpop.eup %672 }
 0x2f5   :  { %v437_v12 = vmul.f32 %v673_v11, %v434_v7 }
 0x2f7   :  { %v439_v14 = vsel %vm438_vm3, %v434_v7, %v437_v12 }
 0x2f8   :  { %v442_v15 = vsel %vm440_vm4, %v441_v13, %v439_v14  ;;  %v675_v16 = vpop.eup %674 }
 0x2f9   :  { %v452_v18 = vmul.f32 0.19866933, %v442_v15  ;;  %v444_v19 = vmul.f32 %v675_v16, %v435_v10 }
 0x2fb   :  { %v454_v20 = vsub.f32 %v450_v17, %v452_v18  ;;  %v446_v23 = vsel %vm445_vm5, %v435_v10, %v444_v19 }
 0x2fc   :  { %v449_v25 = vsel %vm447_vm7, %v448_v22, %v446_v23 }
 0x2fd   :  { %v460_v24 = vsel %vm456_vm6, %v454_v20, %v536_v21  ;;  %v453_v28 = vmul.f32 0.19866933, %v449_v25 }
 0x2fe   :  { %v462_v26 = vsub.f32 %v460_v24, %v427_v3 }
 0x2ff   :  { %v455_v30 = vsub.f32 %v451_v27, %v453_v28 }
 0x300   :  { %v464_v29 = vmul.f32 64.0, %v462_v26 }
 0x301   :  { %v461_v34 = vsel %vm457_vm8, %v455_v30, %v537_v31 }
 0x302   :  { %v468_v33 = vsel %vm422_vm1, %v464_v29, 0.0  ;;  %v463_v35 = vsub.f32 %v461_v34, %v429_v6 }
 0x303   :  { %v470_v36 = vadd.f32 %v468_v33, %v466_v32 }
 0x304   :  { %v465_v37 = vmul.f32 64.0, %v463_v35 }
 0x305   :  { %472 = vst [vmem:[#allocation5] sm:$0xff] %v470_v36 }
 0x306   :  { %v469_v39 = vsel %vm423_vm2, %v465_v37, 0.0 }
 0x307   :  { %v471_v40 = vadd.f32 %v469_v39, %v467_v38 }
 0x309   :  { %473 = vst [vmem:[#allocation5 + $0x8] sm:$0xff] %v471_v40 }
 0x30a   :  { %707 = shalt.err (!%p704_p9)
}
 0x30b   :  { %497 = dma.vmem_to_hbm [thread:$0]  %s492_s2, 256, %s931_s8, [#allocation6], %s724_s15, %s724_s15, %s725_s16  }
 0x30c   :  { %716 = dma.done.wait [#allocation4], 256  }
 0x30d   :  { %717 = vsyncadd [#allocation4], 4294967040 }
 0x30e   :  { %718 = dma.done.wait [#allocation6], 256  }
 0x30f   :  { %719 = vsyncadd [#allocation6], 4294967040 }
 0x310   :  { %504 = vsyncpa [#allocation4], 1 }
 0x311   :  { %505 = vsyncpa [#allocation6], 1 }

</bundles_post_ra>
